<compile_context>
chip_gen: v7x
topology: tpu7x:2x2x1
jax: 0.10.0
libtpu: 0.0.40
codegen_flags: <defaults>
</compile_context>

<pallas_src>
import jax
import jax.numpy as jnp
from jax.experimental import pallas as pl
from jax.experimental.pallas import tpu as pltpu


def _tobit_kernel(x_ref, w_ref, b_ref, out_ref):
    # x_ref: (TILE_B, D), w_ref: (2, D), b_ref: (2, 1), out_ref: (2, TILE_B)
    out = jax.lax.dot_general(
        w_ref[...], x_ref[...],
        dimension_numbers=(((1,), (1,)), ((), ())),   # contract D with D
        preferred_element_type=jnp.float32)
    out_ref[...] = (out + b_ref[...]).astype(out_ref.dtype)


def _round_up(x, m):
    return ((x + m - 1) // m) * m


def _vmem_capacity_bytes():
    """Physical VMEM per TensorCore; conservative fallback if the query fails."""
    try:
        return int(pltpu.get_tpu_info().vmem_capacity_bytes)
    except Exception:
        return 64 * 1024 * 1024   # v7x per-TC size: safe lower bound everywhere


def _pick_tile_b(batch, in_size, vmem_limit_bytes):
    """Largest 128-aligned batch tile whose double-buffered working set
    (lane-padded x tile + weights + bias + (8, tile_b) output) fits the VMEM
    limit, while keeping >= 2 grid steps so both v7x TensorCores get work."""
    lane = 128
    row_bytes = _round_up(in_size, lane) * 4                 # lane-padded f32 row
    # Resident weight (2->8 sublanes padded) + bias buffers, double-buffered.
    fixed = 2 * 8 * _round_up(in_size, lane) * 4 + 2 * 8 * lane * 4
    budget = vmem_limit_bytes - fixed - (2 << 20)            # compiler-scratch headroom
    # Per batch row: double-buffered x tile + double-buffered (8, tile_b) output.
    per_row = 2 * row_bytes + 2 * 8 * 4
    if budget < lane * per_row:
        return None                                          # can't even fit 128 rows
    tile = budget // per_row
    min_steps = 2 if batch >= 2 * lane else 1                # >=2 steps -> megacore shard
    tile = min(tile, _round_up(pl.cdiv(batch, min_steps), lane))
    return max(lane, (tile // lane) * lane)


def rank_model_tobit_forward(input_vec, w_proj, b_proj, w_obs, b_obs):
    """Pallas implementation of rank_model_tobit.forward (dense path).

    Args:
      input_vec: (batch, in_size) float32
      w_proj:    (1, in_size) float32  -- linear_proj weight (PyTorch layout)
      b_proj:    (1,)         float32  -- linear_proj bias
      w_obs:     (1, in_size) float32  -- observe_model weight
      b_obs:     (1,)         float32  -- observe_model bias

    Returns:
      (output_sel, output) -- each (batch, 1), matching the PyTorch module.
    """
    batch, in_size = input_vec.shape
    x = input_vec.astype(jnp.float32)
    # Stacked heads, lane-dense layout: row 0 = linear_proj, row 1 = observe_model.
    w2 = jnp.concatenate([w_proj, w_obs], axis=0).astype(jnp.float32)       # (2, D)
    b2 = jnp.concatenate([b_proj, b_obs], axis=0)[:, None].astype(jnp.float32)  # (2, 1)

    def _xla_fallback():
        out = x @ w2.T + b2.T
        return out[:, 1:2], out[:, 0:1]

    # Small-problem fast path: Pallas dispatch + wrapper plumbing dominates
    # until x is at least ~1 MiB; let XLA fuse the tiny GEMV.
    if batch * in_size * 4 < (1 << 20):
        return _xla_fallback()

    vmem_cap = _vmem_capacity_bytes()
    vmem_limit = min((vmem_cap * 3) // 4, 96 * 1024 * 1024)
    tile_b = _pick_tile_b(batch, in_size, vmem_limit)
    if tile_b is None:
        # Pathologically large in_size: even a 128-row double-buffered tile
        # overflows VMEM. TODO(synk): add a K-tiled accumulator variant.
        return _xla_fallback()

    grid = (pl.cdiv(batch, tile_b),)   # ragged final block masked by Mosaic; no pad copy

    out = pl.pallas_call(
        _tobit_kernel,
        out_shape=jax.ShapeDtypeStruct((2, batch), jnp.float32),
        grid=grid,
        in_specs=[
            pl.BlockSpec((tile_b, in_size), lambda i: (i, 0)),  # streamed x tiles
            pl.BlockSpec((2, in_size), lambda i: (0, 0)),       # resident weights
            pl.BlockSpec((2, 1), lambda i: (0, 0)),             # resident bias
        ],
        out_specs=pl.BlockSpec((2, tile_b), lambda i: (0, i)),  # lane-dense output
        compiler_params=pltpu.CompilerParams(
            dimension_semantics=("parallel",),                  # shard batch across TCs
            vmem_limit_bytes=vmem_limit),
        cost_estimate=pl.CostEstimate(
            flops=4 * batch * in_size,
            bytes_accessed=batch * in_size * 4 + 2 * in_size * 4 + 2 * batch * 4 + 8,
            transcendentals=0),
    )(x, w2, b2)

    output = out[0][:, None]       # linear_proj(input_vec)
    output_sel = out[1][:, None]   # observe_model(input_vec)
    return output_sel, output


if __name__ == "__main__":
    key = jax.random.PRNGKey(0)
    k_x, k_wp, k_bp, k_wo, k_bo = jax.random.split(key, 5)

    # batch=4500 (not a multiple of the 128-row tile quantum) exercises the
    # ragged-final-block Pallas path; in_size=128 keeps the x rows lane-dense.
    batch, in_size = 4500, 128

    x = jax.random.normal(k_x, (batch, in_size), dtype=jnp.float32)

    # xavier_normal_ for Linear(in_size, 1): std = sqrt(2 / (in_size + 1))
    std = (2.0 / (in_size + 1)) ** 0.5
    w_proj = std * jax.random.normal(k_wp, (1, in_size), dtype=jnp.float32)
    w_obs = std * jax.random.normal(k_wo, (1, in_size), dtype=jnp.float32)
    # PyTorch Linear bias default init: uniform(-1/sqrt(in_size), 1/sqrt(in_size))
    bound = 1.0 / (in_size ** 0.5)
    b_proj = jax.random.uniform(k_bp, (1,), minval=-bound, maxval=bound,
                                dtype=jnp.float32)
    b_obs = jax.random.uniform(k_bo, (1,), minval=-bound, maxval=bound,
                               dtype=jnp.float32)

    fwd = jax.jit(rank_model_tobit_forward)
    output_sel, output = fwd(x, w_proj, b_proj, w_obs, b_obs)
    jax.block_until_ready((output_sel, output))

    # Reference check in plain JAX (highest-precision matmul).
    hi = jax.lax.Precision.HIGHEST
    ref_output = jnp.dot(x, w_proj.T, precision=hi) + b_proj
    ref_output_sel = jnp.dot(x, w_obs.T, precision=hi) + b_obs
    assert output.shape == (batch, 1) and output_sel.shape == (batch, 1)
    assert jnp.allclose(output, ref_output, rtol=1e-3, atol=1e-3)
    assert jnp.allclose(output_sel, ref_output_sel, rtol=1e-3, atol=1e-3)

    # Also sanity-check the tiny-shape fast path (non-Pallas branch).
    small_sel, small_out = rank_model_tobit_forward(
        x[:4], w_proj, b_proj, w_obs, b_obs)
    assert jnp.allclose(small_out, ref_output[:4], rtol=1e-3, atol=1e-3)
    assert jnp.allclose(small_sel, ref_output_sel[:4], rtol=1e-3, atol=1e-3)

    print("KERNEL_OK")
</pallas_src>

<mosaic_0001>
module attributes {stable_mosaic.version = 11 : i64} {
  func.func @_tobit_kernel(%arg0: i32, %arg1: memref<2304x128xf32, #tpu.memory_space<vmem>>, %arg2: memref<2x128xf32, #tpu.memory_space<vmem>>, %arg3: memref<2x1xf32, #tpu.memory_space<vmem>>, %arg4: memref<2x2304xf32, #tpu.memory_space<vmem>>) attributes {dimension_semantics = [#tpu.dimension_semantics<parallel>], iteration_bounds = array<i64: 2>, scalar_prefetch = 0 : i64, scratch_operands = 0 : i64, tpu.core_type = #tpu.core_type<tc>, window_params = [{transform_indices = @transform_0, window_bounds = array<i64: 2304, 128>}, {pipeline_mode = #tpu.pipeline_mode<synchronous>, transform_indices = @transform_1, window_bounds = array<i64: 2, 128>}, {pipeline_mode = #tpu.pipeline_mode<synchronous>, transform_indices = @transform_2, window_bounds = array<i64: 2, 1>}, {transform_indices = @transform_3, window_bounds = array<i64: 2, 2304>}]} {
    %c0 = arith.constant 0 : index
    %c0_0 = arith.constant 0 : index
    %0 = vector.load %arg2[%c0, %c0_0] : memref<2x128xf32, #tpu.memory_space<vmem>>, vector<2x128xf32>
    %c0_1 = arith.constant 0 : index
    %c0_2 = arith.constant 0 : index
    %1 = vector.load %arg1[%c0_1, %c0_2] : memref<2304x128xf32, #tpu.memory_space<vmem>>, vector<2304x128xf32>
    %cst = arith.constant dense<0.000000e+00> : vector<2x2304xf32>
    %2 = tpu.matmul %0, %1, %cst {dimension_numbers = #tpu.dot_dimension_numbers<[1], [1], [0], [0], [0, 0, 1, 0], [], []>} : vector<2x128xf32>, vector<2304x128xf32>, vector<2x2304xf32> -> vector<2x2304xf32>
    %c0_3 = arith.constant 0 : index
    %c0_4 = arith.constant 0 : index
    %3 = vector.load %arg3[%c0_3, %c0_4] : memref<2x1xf32, #tpu.memory_space<vmem>>, vector<2x1xf32>
    %4 = vector.broadcast %3 : vector<2x1xf32> to vector<2x2304xf32>
    %5 = arith.addf %2, %4 : vector<2x2304xf32>
    %c0_5 = arith.constant 0 : index
    %c0_6 = arith.constant 0 : index
    %6 = vector.load %arg4[%c0_5, %c0_6] : memref<2x2304xf32, #tpu.memory_space<vmem>>, vector<2x2304xf32>
    tpu.vector_store %arg4[%c0_5, %c0_6], %5 {strides = array<i32>} : memref<2x2304xf32, #tpu.memory_space<vmem>>, vector<2x2304xf32>,
    return
  }
  func.func @transform_0(%arg0: i32) -> (i32, i32) {
    %c0_i32 = arith.constant 0 : i32
    %c0_i32_0 = arith.constant 0 : i32
    return %arg0, %c0_i32 : i32, i32
  }
  func.func @transform_1(%arg0: i32) -> (i32, i32) {
    %c0_i32 = arith.constant 0 : i32
    %c0_i32_0 = arith.constant 0 : i32
    %c0_i32_1 = arith.constant 0 : i32
    return %c0_i32, %c0_i32_0 : i32, i32
  }
  func.func @transform_2(%arg0: i32) -> (i32, i32) {
    %c0_i32 = arith.constant 0 : i32
    %c0_i32_0 = arith.constant 0 : i32
    %c0_i32_1 = arith.constant 0 : i32
    return %c0_i32, %c0_i32_0 : i32, i32
  }
  func.func @transform_3(%arg0: i32) -> (i32, i32) {
    %c0_i32 = arith.constant 0 : i32
    %c0_i32_0 = arith.constant 0 : i32
    return %c0_i32, %arg0 : i32, i32
  }
}

</mosaic_0001>

<bundles_post_ra>
// kernel: rank_model_tobit_forward.1
= control target key start
LH: loop header
LB: loop body
LE: loop exit
PB: predicated region body
PF: predicated region fallthrough
CT: control target
= control target key end

     0   :  { %8 = vsyncpa [#allocation3], 0  ;;  %s2509_s0 = inlined_call_operand.hbm [shape: f32[4500,128], index: 0, kind: input, shape index: {}]   ;;  %s2510_s1 = inlined_call_operand.vmem [shape: f32[2,128], index: 1, kind: input, shape index: {}]   ;;  %s2511_s2 = inlined_call_operand.vmem [shape: f32[2,1], index: 2, kind: input, shape index: {}]   ;;  %s2512_s3 = inlined_call_operand.vmem [shape: f32[2,4500], index: 3, kind: output, shape index: {}]  }
   0x1   :  { %10 = vsyncpa [#allocation3 + $0x1], 0  ;;  %s2047_s12 = smov 0   ;;  %s2049_s13 = smov 0  }
   0x2   :  { %s2051_s14 = smov 0   ;;  %s2053_s15 = smov 0  }
   0x3 LB: > { %s1308_s16 = sadd.s32 4294967295, %s2020_s15   ;;  %s2067_s17 = sadd.s32 1, %s2020_s15   ;;  %s2020_s15 = sphi %s2053_s15, %s2517_s15   ;;  %s2016_s14 = sphi %s2051_s14, %s2516_s14   ;;  %s2012_s13 = sphi %s2049_s13, %s2515_s13   ;;  %s2008_s12 = sphi %s2047_s12, %s2514_s12  }
   0x4   : > { %s20_s18 = ssub.s32 %s2020_s15, %s2067_s17  ;;  %s23_s19 = sadd.s32 1, %s2016_s14 }
   0x5   : > { %p21_p0 = scmp.eq.s32.totalorder %s20_s18, 0  ;;  %p30_p1 = scmp.ne.s32.totalorder %s2016_s14, %s2012_s13 }
   0x6   : > { %p31_p2 = scmp.eq.s32.totalorder %s2020_s15, 0  ;;  %p36_p3 = scmp.ne.s32.totalorder %s2012_s13, %s2008_s12 }
   0x7   : > { %s2077_s20 = scalar_select %p21_p0, %s2016_s14, %s23_s19  }
   0x8   : > { %p32_p4 = por %p31_p2, %p30_p1  ;;  %p37_p5 = scmp.eq.s32.totalorder %s1308_s16, 0 }
   0x9   : > { %p1311_p7 = scmp.ge.s32.totalorder %s2020_s15, 2 }
   0xa   : > { %p2081_p6 = por %p37_p5, %p36_p3 }
   0xb   : > { %130 = sbr.rel (%p1311_p7) target bundleno = 53 (0x35), region = 24 }
  0x12   : > { %133 = sbr.rel (!%p32_p4) target bundleno = 53 (0x35), region = 28  ;;  %s134_s22 = sand.u32 (%p32_p4), 1, %s2016_s14  }
  0x13   : > { %s139_s23 = smul.u32 (%p32_p4), 288, %s2020_s15  ;;  %s2091_s28 = scalar_lea.sflag (%p32_p4), [#allocation3], %s134_s22 }
  0x14   : > { %s1917_s24 = smul.u32 (%p32_p4), 2304, %s134_s22 }
  0x15   : > { %s140_s25 = ssub.s32 (%p32_p4), 563, %s139_s23 }
  0x16   : > { %p141_p8 = scmp.lt.s32.totalorder (%p32_p4), %s140_s25, 288  ;;  %s138_s29 = scalar_lea.vmem (%p32_p4), [#allocation2], %s1917_s24 }
  0x19   : > { %s2519_s25 = smov (!%p141_p8, %s140_s25), 288 }
  0x1a   : > { %s2088_s26 = sshll.u32 %s2519_s25, 7 }
  0x1b   : > { %s145_s27 = ssub.s32 36864, %s2088_s26 }
  0x1c   : > { %146 = vsyncadd %s2091_s28, %s145_s27  ;;  %p1313_p9 = scmp.ne.s32.totalorder %s2088_s26, 0  ;;  %s1322_s30 = smul.u32 36864, %s2020_s15 }
  0x1d   : > { %s151_s4 = sshll.u32 %s138_s29, 4  ;;  %s1962_s11 = scalar_lea.hbm %s2509_s0, 72064  ;;  %s2101_s4 = int_to_ptr.vmem [resolvable:$true] %s151_s4 }
  0x1e   : > { %s2099_s7 = scalar_lea.hbm %s2509_s0, %s1322_s30 }
  0x1f   : > { %s1958_s8 = scalar_lea.hbm %s2099_s7, %s2088_s26  ;;  %p1963_p13 = scmp.lt.u32.totalorder %s2099_s7, %s2509_s0 }
  0x20   : > { %p1959_p10 = scmp.ne.s32.totalorder %s2099_s7, %s1958_s8  ;;  %p1964_p0 = scmp.lt.u32.totalorder %s1962_s11, %s1958_s8 }
  0x21   : > { %p1966_p2 = scmp.lt.u32.totalorder %s1958_s8, %s2099_s7 }
  0x22   : > { %p1960_p11 = pnand %p1959_p10, %p1313_p9  ;;  %p1965_p1 = por %p1964_p0, %p1963_p13 }
  0x24   : > { %p1961_p12 = pneg %p1960_p11  ;;  %p1967_p3 = por %p1966_p2, %p1965_p1 }
  0x26   : > { %p1968_p4 = pnand %p1967_p3, %p1961_p12 }
  0x28   : > { %1971 = shalt.err (!%p1968_p4)
}
  0x29   : > { %s1972_s19 = scalar_lea.vmem %s2101_s4, %s2088_s26  ;;  %s2022_s22 = smov [#allocation2]  }
  0x2a   : > { %p1973_p5 = scmp.ne.s32.totalorder %s2101_s4, %s1972_s19  ;;  %s1976_s23 = sshll.u32 %s2022_s22, 4  ;;  %s1977_s23 = int_to_ptr.vmem [resolvable:$false] %s1976_s23 }
  0x2b   : > { %s1978_s24 = scalar_lea.vmem %s1977_s23, 73728  ;;  %p1979_p10 = scmp.lt.s32.totalorder %s2101_s4, %s1977_s23 }
  0x2c   : > { %p1974_p7 = pnand %p1973_p5, %p1313_p9  ;;  %p1980_p11 = scmp.lt.s32.totalorder %s1978_s24, %s1972_s19 }
  0x2e   : > { %p1975_p8 = pneg %p1974_p7  ;;  %p1981_p13 = por %p1980_p11, %p1979_p10 }
  0x30   : > { %p1982_p0 = pnand %p1981_p13, %p1975_p8 }
  0x32   : > { %1985 = shalt.err (!%p1982_p0)
}
  0x33   : > { %s2023_s25 = smov 128   ;;  %s2024_s27 = smov 8  }
  0x34   : > { %157 = dma.hbm_to_vmem [thread:$0]  (%p1313_p9), %s2099_s7, %s2088_s26, %s2101_s4, %s2091_s28, %s2023_s25, %s2023_s25, %s2024_s27  }
  0x35 PF: > { %p1317_p12 = scmp.ge.s32.totalorder %s2020_s15, 1  ;;  %p159_p1 = scmp.lt.s32.totalorder %s2020_s15, 3 }
  0x37   : > { %p160_p2 = pnand %p1317_p12, %p159_p1 }
  0x38   : > { %s165_s29 = sand.u32 (!%p160_p2), 1, %s2012_s13  }
  0x39   : > { %163 = sbr.rel (%p160_p2) target bundleno = 607 (0x25f), region = 32  ;;  %s166_s5 = scalar_lea.sflag (!%p160_p2), [#allocation3], %s165_s29 }
  0x3a   : > { %s1918_s30 = smul.u32 (!%p160_p2), 2304, %s165_s29 }
  0x3c   : > { %s2131_s6 = scalar_lea.vmem (!%p160_p2), [#allocation2], %s1918_s30 }
  0x40   : > { %2003 = dma.done.wait (%p2081_p6), %s166_s5, 36864  }
  0x41   : > { %2005 = vsyncadd (%p2081_p6), %s166_s5, 4294930432  ;;  %v220_v0 = vld [vmem:[%s2131_s6 + $0x80] sm:$0xff]  ;;  %v221_v1 = vld [vmem:[%s2131_s6 + $0x88] sm:$0xff]  ;;  %v2025_v51 = vmov 0   ;;  %s197_s7 = smul.u32 18, %s1308_s16 }
  0x42   : > { %v252_v2 = vld [vmem:[%s2131_s6 + $0x180] sm:$0xff]  ;;  %v1629_v3 = vpack.c.bf16 %v221_v1, %v220_v0  ;;  %v253_v4 = vld [vmem:[%s2131_s6 + $0x188] sm:$0xff]  ;;  %v222_v11 = vld [vmem:[%s2131_s6 + $0x90] sm:$0xff]  ;;  %1956 = vset.pattern.permute.xlu0 %v2025_v51 }
  0x43   : > { %v204_v5 = vld [vmem:[%s2131_s6] sm:$0xff]  ;;  %v205_v6 = vld [vmem:[%s2131_s6 + $0x8] sm:$0xff]  ;;  %v1661_v7 = vpack.c.bf16 %v253_v4, %v252_v2  ;;  %v223_v13 = vld [vmem:[%s2131_s6 + $0x98] sm:$0xff]  ;;  %p198_p6 = scmp.lt.s32.totalorder %s197_s7, 35 }
  0x44   : > { %v1631_v8 = vpack.c.bf16 %v205_v6, %v204_v5  ;;  %v236_v9 = vld [vmem:[%s2131_s6 + $0x100] sm:$0xff]  ;;  %v237_v10 = vld [vmem:[%s2131_s6 + $0x108] sm:$0xff]  ;;  %1630 = vmatprep.subr.bf16.mxu0 %v1629_v3  ;;  %v254_v14 = vld [vmem:[%s2131_s6 + $0x190] sm:$0xff]  ;;  %v1633_v16 = vpack.c.bf16 %v223_v13, %v222_v11 }
  0x45   : > { %v1663_v12 = vpack.c.bf16 %v237_v10, %v236_v9  ;;  %v255_v15 = vld [vmem:[%s2131_s6 + $0x198] sm:$0xff]  ;;  %1662 = vmatprep.subr.bf16.mxu1 %v1661_v7  ;;  %v206_v18 = vld [vmem:[%s2131_s6 + $0x10] sm:$0xff]  ;;  %v224_v22 = vld [vmem:[%s2131_s6 + $0xa0] sm:$0xff]  ;;  %s2521_s7 = smov (!%p198_p6, %s197_s7), 35 }
  0x46   : > { %1632 = vmatpush3.bf16.xpose.msra.mxu0 %v1631_v8  ;;  %v1665_v17 = vpack.c.bf16 %v255_v15, %v254_v14  ;;  %v207_v19 = vld [vmem:[%s2131_s6 + $0x18] sm:$0xff]  ;;  %v238_v20 = vld [vmem:[%s2131_s6 + $0x110] sm:$0xff]  ;;  %v225_v23 = vld [vmem:[%s2131_s6 + $0xa8] sm:$0xff]  ;;  %s1318_s15 = sshll.u32 %s2521_s7, 1 }
  0x47   : > { %1664 = vmatpush3.bf16.xpose.msra.mxu1 %v1663_v12  ;;  %1634 = vmatprep.subr.bf16.mxu0 %v1633_v16  ;;  %v239_v21 = vld [vmem:[%s2131_s6 + $0x118] sm:$0xff]  ;;  %v256_v24 = vld [vmem:[%s2131_s6 + $0x1a0] sm:$0xff]  ;;  %v257_v25 = vld [vmem:[%s2131_s6 + $0x1a8] sm:$0xff]  ;;  %v1635_v26 = vpack.c.bf16 %v207_v19, %v206_v18  ;;  %v1637_v28 = vpack.c.bf16 %v225_v23, %v224_v22  ;;  %s2454_s9 = scalar_lea.vmem %s2512_s3, %s1318_s15 }
  0x48   : > { %1666 = vmatprep.subr.bf16.mxu1 %v1665_v17  ;;  %v1667_v27 = vpack.c.bf16 %v239_v21, %v238_v20  ;;  %v1669_v29 = vpack.c.bf16 %v257_v25, %v256_v24  ;;  %v208_v30 = vld [vmem:[%s2131_s6 + $0x20] sm:$0xff]  ;;  %v209_v31 = vld [vmem:[%s2131_s6 + $0x28] sm:$0xff]  ;;  %v226_v34 = vld [vmem:[%s2131_s6 + $0xb0] sm:$0xff] }
  0x49   : > { %v240_v32 = vld [vmem:[%s2131_s6 + $0x120] sm:$0xff]  ;;  %v241_v33 = vld [vmem:[%s2131_s6 + $0x128] sm:$0xff]  ;;  %v227_v35 = vld [vmem:[%s2131_s6 + $0xb8] sm:$0xff]  ;;  %v1639_v38 = vpack.c.bf16 %v209_v31, %v208_v30 }
  0x4a   : > { %v258_v36 = vld [vmem:[%s2131_s6 + $0x1b0] sm:$0xff]  ;;  %v259_v37 = vld [vmem:[%s2131_s6 + $0x1b8] sm:$0xff]  ;;  %v1671_v39 = vpack.c.bf16 %v241_v33, %v240_v32  ;;  %v1641_v40 = vpack.c.bf16 %v227_v35, %v226_v34  ;;  %v2171_v45 = vld [vmem:[%s2510_s1] sm:$0x3] }
  0x4b   : > { %v1673_v41 = vpack.c.bf16 %v259_v37, %v258_v36  ;;  %v210_v42 = vld [vmem:[%s2131_s6 + $0x30] sm:$0xff]  ;;  %v211_v43 = vld [vmem:[%s2131_s6 + $0x38] sm:$0xff]  ;;  %v228_v47 = vld [vmem:[%s2131_s6 + $0xc0] sm:$0xff]  ;;  %1355 = vmatprep.mubr.f32.mxu0 %v2171_v45  ;;  %1389 = vmatprep.mubr.f32.mxu1 %v2171_v45 }
  0x4c   : > { %v242_v44 = vld [vmem:[%s2131_s6 + $0x130] sm:$0xff]  ;;  %v243_v46 = vld [vmem:[%s2131_s6 + $0x138] sm:$0xff]  ;;  %v229_v48 = vld [vmem:[%s2131_s6 + $0xc8] sm:$0xff]  ;;  %v1643_v52 = vpack.c.bf16 %v211_v43, %v210_v42 }
  0x4d   : > { %v260_v49 = vld [vmem:[%s2131_s6 + $0x1c0] sm:$0xff]  ;;  %v261_v50 = vld [vmem:[%s2131_s6 + $0x1c8] sm:$0xff]  ;;  %v1675_v53 = vpack.c.bf16 %v243_v46, %v242_v44  ;;  %v1645_v54 = vpack.c.bf16 %v229_v48, %v228_v47  ;;  %v230_v60 = vld [vmem:[%s2131_s6 + $0xd0] sm:$0xff] }
  0x4e   : > { %1636 = vmatpush3.bf16.xpose.msra.mxu0 %v1635_v26  ;;  %v1677_v55 = vpack.c.bf16 %v261_v50, %v260_v49  ;;  %v212_v56 = vld [vmem:[%s2131_s6 + $0x40] sm:$0xff]  ;;  %v213_v57 = vld [vmem:[%s2131_s6 + $0x48] sm:$0xff]  ;;  %v231_v61 = vld [vmem:[%s2131_s6 + $0xd8] sm:$0xff] }
  0x4f   : > { %1668 = vmatpush3.bf16.xpose.msra.mxu1 %v1667_v27  ;;  %1638 = vmatprep.subr.bf16.mxu0 %v1637_v28  ;;  %v244_v58 = vld [vmem:[%s2131_s6 + $0x140] sm:$0xff]  ;;  %v245_v59 = vld [vmem:[%s2131_s6 + $0x148] sm:$0xff]  ;;  %v262_v62 = vld [vmem:[%s2131_s6 + $0x1d0] sm:$0xff]  ;;  %v1647_v0 = vpack.c.bf16 %v213_v57, %v212_v56  ;;  %v1649_v2 = vpack.c.bf16 %v231_v61, %v230_v60 }
  0x50   : > { %1670 = vmatprep.subr.bf16.mxu1 %v1669_v29  ;;  %v263_v63 = vld [vmem:[%s2131_s6 + $0x1d8] sm:$0xff]  ;;  %v1679_v1 = vpack.c.bf16 %v245_v59, %v244_v58  ;;  %v214_v4 = vld [vmem:[%s2131_s6 + $0x50] sm:$0xff]  ;;  %v232_v8 = vld [vmem:[%s2131_s6 + $0xe0] sm:$0xff] }
  0x51   : > { %v1681_v3 = vpack.c.bf16 %v263_v63, %v262_v62  ;;  %v215_v5 = vld [vmem:[%s2131_s6 + $0x58] sm:$0xff]  ;;  %v246_v6 = vld [vmem:[%s2131_s6 + $0x150] sm:$0xff]  ;;  %v233_v9 = vld [vmem:[%s2131_s6 + $0xe8] sm:$0xff] }
  0x52   : > { %v247_v7 = vld [vmem:[%s2131_s6 + $0x158] sm:$0xff]  ;;  %v264_v10 = vld [vmem:[%s2131_s6 + $0x1e0] sm:$0xff]  ;;  %v265_v11 = vld [vmem:[%s2131_s6 + $0x1e8] sm:$0xff]  ;;  %v1651_v12 = vpack.c.bf16 %v215_v5, %v214_v4  ;;  %v1653_v14 = vpack.c.bf16 %v233_v9, %v232_v8 }
  0x53   : > { %v1683_v13 = vpack.c.bf16 %v247_v7, %v246_v6  ;;  %v1685_v15 = vpack.c.bf16 %v265_v11, %v264_v10  ;;  %v216_v16 = vld [vmem:[%s2131_s6 + $0x60] sm:$0xff]  ;;  %v217_v17 = vld [vmem:[%s2131_s6 + $0x68] sm:$0xff]  ;;  %v234_v20 = vld [vmem:[%s2131_s6 + $0xf0] sm:$0xff] }
  0x54   : > { %v248_v18 = vld [vmem:[%s2131_s6 + $0x160] sm:$0xff]  ;;  %v249_v19 = vld [vmem:[%s2131_s6 + $0x168] sm:$0xff]  ;;  %v235_v21 = vld [vmem:[%s2131_s6 + $0xf8] sm:$0xff]  ;;  %v1655_v24 = vpack.c.bf16 %v217_v17, %v216_v16 }
  0x55   : > { %v266_v22 = vld [vmem:[%s2131_s6 + $0x1f0] sm:$0xff]  ;;  %v267_v23 = vld [vmem:[%s2131_s6 + $0x1f8] sm:$0xff]  ;;  %v1687_v25 = vpack.c.bf16 %v249_v19, %v248_v18  ;;  %v1657_v26 = vpack.c.bf16 %v235_v21, %v234_v20  ;;  %v492_v28 = vld [vmem:[%s2511_s2] sm:$0x3] }
  0x56   : > { %1640 = vmatpush3.bf16.xpose.msra.mxu0 %v1639_v38  ;;  %v1689_v27 = vpack.c.bf16 %v267_v23, %v266_v22  ;;  %495 = vperm.xlu0 %1956, %v492_v28   ;;  %v218_v29 = vld [vmem:[%s2131_s6 + $0x70] sm:$0xff]  ;;  %v219_v30 = vld [vmem:[%s2131_s6 + $0x78] sm:$0xff]  ;;  %v284_v33 = vld [vmem:[%s2131_s6 + $0x280] sm:$0xff] }
  0x57   : > { %1672 = vmatpush3.bf16.xpose.msra.mxu1 %v1671_v39  ;;  %1642 = vmatprep.subr.bf16.mxu0 %v1641_v40  ;;  %v250_v31 = vld [vmem:[%s2131_s6 + $0x170] sm:$0xff]  ;;  %v251_v32 = vld [vmem:[%s2131_s6 + $0x178] sm:$0xff]  ;;  %v285_v34 = vld [vmem:[%s2131_s6 + $0x288] sm:$0xff]  ;;  %v1659_v37 = vpack.c.bf16 %v219_v30, %v218_v29 }
  0x58   : > { %1674 = vmatprep.subr.bf16.mxu1 %v1673_v41  ;;  %v316_v35 = vld [vmem:[%s2131_s6 + $0x380] sm:$0xff]  ;;  %v317_v36 = vld [vmem:[%s2131_s6 + $0x388] sm:$0xff]  ;;  %v1691_v38 = vpack.c.bf16 %v251_v32, %v250_v31  ;;  %v1693_v39 = vpack.c.bf16 %v285_v34, %v284_v33  ;;  %v286_v46 = vld [vmem:[%s2131_s6 + $0x290] sm:$0xff] }
  0x59   : > { %v1725_v40 = vpack.c.bf16 %v317_v36, %v316_v35  ;;  %v268_v41 = vld [vmem:[%s2131_s6 + $0x200] sm:$0xff]  ;;  %v269_v42 = vld [vmem:[%s2131_s6 + $0x208] sm:$0xff]  ;;  %v287_v47 = vld [vmem:[%s2131_s6 + $0x298] sm:$0xff] }
  0x5a   : > { %v300_v43 = vld [vmem:[%s2131_s6 + $0x300] sm:$0xff]  ;;  %v301_v44 = vld [vmem:[%s2131_s6 + $0x308] sm:$0xff]  ;;  %v318_v48 = vld [vmem:[%s2131_s6 + $0x390] sm:$0xff]  ;;  %v1695_v50 = vpack.c.bf16 %v269_v42, %v268_v41 }
  0x5b   : > { %v319_v49 = vld [vmem:[%s2131_s6 + $0x398] sm:$0xff]  ;;  %v1727_v51 = vpack.c.bf16 %v301_v44, %v300_v43  ;;  %v302_v56 = vld [vmem:[%s2131_s6 + $0x310] sm:$0xff]  ;;  %v288_v58 = vld [vmem:[%s2131_s6 + $0x2a0] sm:$0xff] }
  0x5c   : > { %v303_v57 = vld [vmem:[%s2131_s6 + $0x318] sm:$0xff]  ;;  %v289_v59 = vld [vmem:[%s2131_s6 + $0x2a8] sm:$0xff]  ;;  %v320_v60 = vld [vmem:[%s2131_s6 + $0x3a0] sm:$0xff] }
  0x5d   : > { %v321_v61 = vld [vmem:[%s2131_s6 + $0x3a8] sm:$0xff]  ;;  %v1731_v63 = vpack.c.bf16 %v303_v57, %v302_v56  ;;  %v304_v4 = vld [vmem:[%s2131_s6 + $0x320] sm:$0xff]  ;;  %v290_v6 = vld [vmem:[%s2131_s6 + $0x2b0] sm:$0xff] }
  0x5e   : > { %1644 = vmatpush3.bf16.xpose.msra.mxu0 %v1643_v52  ;;  %v1697_v52 = vpack.c.bf16 %v287_v47, %v286_v46  ;;  %v305_v5 = vld [vmem:[%s2131_s6 + $0x328] sm:$0xff]  ;;  %v291_v7 = vld [vmem:[%s2131_s6 + $0x2b8] sm:$0xff]  ;;  %v322_v8 = vld [vmem:[%s2131_s6 + $0x3b0] sm:$0xff] }
  0x5f   : > { %1676 = vmatpush3.bf16.xpose.msra.mxu1 %v1675_v53  ;;  %1646 = vmatprep.subr.bf16.mxu0 %v1645_v54  ;;  %v1729_v53 = vpack.c.bf16 %v319_v49, %v318_v48  ;;  %v270_v54 = vld [vmem:[%s2131_s6 + $0x210] sm:$0xff]  ;;  %v323_v9 = vld [vmem:[%s2131_s6 + $0x3b8] sm:$0xff]  ;;  %v1735_v11 = vpack.c.bf16 %v305_v5, %v304_v4  ;;  %v292_v18 = vld [vmem:[%s2131_s6 + $0x2c0] sm:$0xff] }
  0x60   : > { %1678 = vmatprep.subr.bf16.mxu1 %v1677_v55  ;;  %v271_v55 = vld [vmem:[%s2131_s6 + $0x218] sm:$0xff]  ;;  %v306_v16 = vld [vmem:[%s2131_s6 + $0x330] sm:$0xff]  ;;  %v293_v19 = vld [vmem:[%s2131_s6 + $0x2c8] sm:$0xff] }
  0x61   : > { %v1699_v62 = vpack.c.bf16 %v271_v55, %v270_v54  ;;  %v307_v17 = vld [vmem:[%s2131_s6 + $0x338] sm:$0xff]  ;;  %v324_v20 = vld [vmem:[%s2131_s6 + $0x3c0] sm:$0xff]  ;;  %v325_v21 = vld [vmem:[%s2131_s6 + $0x3c8] sm:$0xff] }
  0x62   : > { %v1739_v23 = vpack.c.bf16 %v307_v17, %v306_v16  ;;  %v308_v28 = vld [vmem:[%s2131_s6 + $0x340] sm:$0xff]  ;;  %v309_v29 = vld [vmem:[%s2131_s6 + $0x348] sm:$0xff]  ;;  %v294_v30 = vld [vmem:[%s2131_s6 + $0x2d0] sm:$0xff] }
  0x63   : > { %v295_v31 = vld [vmem:[%s2131_s6 + $0x2d8] sm:$0xff]  ;;  %v326_v32 = vld [vmem:[%s2131_s6 + $0x3d0] sm:$0xff]  ;;  %v1743_v35 = vpack.c.bf16 %v309_v29, %v308_v28  ;;  %v296_v42 = vld [vmem:[%s2131_s6 + $0x2e0] sm:$0xff] }
  0x64   : > { %v327_v33 = vld [vmem:[%s2131_s6 + $0x3d8] sm:$0xff]  ;;  %v1713_v36 = vpack.c.bf16 %v295_v31, %v294_v30  ;;  %v297_v43 = vld [vmem:[%s2131_s6 + $0x2e8] sm:$0xff]  ;;  %v328_v44 = vld [vmem:[%s2131_s6 + $0x3e0] sm:$0xff] }
  0x65   : > { %v311_v41 = vld [vmem:[%s2131_s6 + $0x358] sm:$0xff]  ;;  %v329_v46 = vld [vmem:[%s2131_s6 + $0x3e8] sm:$0xff]  ;;  %v1717_v49 = vpack.c.bf16 %v297_v43, %v296_v42  ;;  %v298_v55 = vld [vmem:[%s2131_s6 + $0x2f0] sm:$0xff] }
  0x66   : > { %1648 = vmatpush3.bf16.xpose.msra.mxu0 %v1647_v0  ;;  %v1701_v0 = vpack.c.bf16 %v289_v59, %v288_v58  ;;  %v313_v54 = vld [vmem:[%s2131_s6 + $0x368] sm:$0xff]  ;;  %v299_v56 = vld [vmem:[%s2131_s6 + $0x2f8] sm:$0xff]  ;;  %v330_v57 = vld [vmem:[%s2131_s6 + $0x3f0] sm:$0xff] }
  0x67   : > { %1680 = vmatpush3.bf16.xpose.msra.mxu1 %v1679_v1  ;;  %1650 = vmatprep.subr.bf16.mxu0 %v1649_v2  ;;  %v1733_v1 = vpack.c.bf16 %v321_v61, %v320_v60  ;;  %v272_v2 = vld [vmem:[%s2131_s6 + $0x220] sm:$0xff]  ;;  %v331_v58 = vld [vmem:[%s2131_s6 + $0x3f8] sm:$0xff]  ;;  %v1721_v61 = vpack.c.bf16 %v299_v56, %v298_v55  ;;  %v349_v4 = vld [vmem:[%s2131_s6 + $0x488] sm:$0xff] }
  0x68   : > { %1682 = vmatprep.subr.bf16.mxu1 %v1681_v3  ;;  %v273_v3 = vld [vmem:[%s2131_s6 + $0x228] sm:$0xff]  ;;  %v380_v5 = vld [vmem:[%s2131_s6 + $0x580] sm:$0xff]  ;;  %v351_v16 = vld [vmem:[%s2131_s6 + $0x498] sm:$0xff] }
  0x69   : > { %v1703_v10 = vpack.c.bf16 %v273_v3, %v272_v2  ;;  %v315_v2 = vld [vmem:[%s2131_s6 + $0x378] sm:$0xff]  ;;  %v348_v3 = vld [vmem:[%s2131_s6 + $0x480] sm:$0xff]  ;;  %v382_v17 = vld [vmem:[%s2131_s6 + $0x590] sm:$0xff] }
  0x6a   : > { %v353_v28 = vld [vmem:[%s2131_s6 + $0x4a8] sm:$0xff]  ;;  %v384_v29 = vld [vmem:[%s2131_s6 + $0x5a0] sm:$0xff]  ;;  %v387_v42 = vld [vmem:[%s2131_s6 + $0x5b8] sm:$0xff] }
  0x6b   : > { %v385_v30 = vld [vmem:[%s2131_s6 + $0x5a8] sm:$0xff] }
  0x6c   : > { %v389_v55 = vld [vmem:[%s2131_s6 + $0x5c8] sm:$0xff] }
  0x6e   : > { %1652 = vmatpush3.bf16.xpose.msra.mxu0 %v1651_v12  ;;  %v1705_v12 = vpack.c.bf16 %v291_v7, %v290_v6  ;;  %v381_v6 = vld [vmem:[%s2131_s6 + $0x588] sm:$0xff] }
  0x6f   : > { %1684 = vmatpush3.bf16.xpose.msra.mxu1 %v1683_v13  ;;  %1654 = vmatprep.subr.bf16.mxu0 %v1653_v14  ;;  %v1737_v13 = vpack.c.bf16 %v323_v9, %v322_v8  ;;  %v274_v14 = vld [vmem:[%s2131_s6 + $0x230] sm:$0xff]  ;;  %v1757_v9 = vpack.c.bf16 %v349_v4, %v348_v3  ;;  %v391_v3 = vld [vmem:[%s2131_s6 + $0x5d8] sm:$0xff] }
  0x70   : > { %1686 = vmatprep.subr.bf16.mxu1 %v1685_v15  ;;  %v275_v15 = vld [vmem:[%s2131_s6 + $0x238] sm:$0xff] }
  0x71   : > { %v1707_v22 = vpack.c.bf16 %v275_v15, %v274_v14  ;;  %v365_v14 = vld [vmem:[%s2131_s6 + $0x508] sm:$0xff]  ;;  %v350_v15 = vld [vmem:[%s2131_s6 + $0x490] sm:$0xff] }
  0x76   : > { %1656 = vmatpush3.bf16.xpose.msra.mxu0 %v1655_v24  ;;  %v1709_v24 = vpack.c.bf16 %v293_v19, %v292_v18  ;;  %v383_v18 = vld [vmem:[%s2131_s6 + $0x598] sm:$0xff] }
  0x77   : > { %1688 = vmatpush3.bf16.xpose.msra.mxu1 %v1687_v25  ;;  %1658 = vmatprep.subr.bf16.mxu0 %v1657_v26  ;;  %v1741_v25 = vpack.c.bf16 %v325_v21, %v324_v20  ;;  %v276_v26 = vld [vmem:[%s2131_s6 + $0x240] sm:$0xff]  ;;  %v1761_v21 = vpack.c.bf16 %v351_v16, %v350_v15  ;;  %v393_v15 = vld [vmem:[%s2131_s6 + $0x5e8] sm:$0xff] }
  0x78   : > { %1690 = vmatprep.subr.bf16.mxu1 %v1689_v27  ;;  %v277_v27 = vld [vmem:[%s2131_s6 + $0x248] sm:$0xff] }
  0x79   : > { %v1711_v34 = vpack.c.bf16 %v277_v27, %v276_v26  ;;  %v367_v26 = vld [vmem:[%s2131_s6 + $0x518] sm:$0xff]  ;;  %v352_v27 = vld [vmem:[%s2131_s6 + $0x4a0] sm:$0xff] }
  0x7e   : > { %1660 = vmatpush3.bf16.xpose.msra.mxu0 %v1659_v37  ;;  %v1745_v37 = vpack.c.bf16 %v327_v33, %v326_v32  ;;  %v1765_v33 = vpack.c.bf16 %v353_v28, %v352_v27  ;;  %v395_v27 = vld [vmem:[%s2131_s6 + $0x5f8] sm:$0xff] }
  0x7f   : > { %1692 = vmatpush3.bf16.xpose.msra.mxu1 %v1691_v38  ;;  %1694 = vmatprep.subr.bf16.mxu0 %v1693_v39  ;;  %v278_v38 = vld [vmem:[%s2131_s6 + $0x250] sm:$0xff]  ;;  %v279_v39 = vld [vmem:[%s2131_s6 + $0x258] sm:$0xff] }
  0x80   : > { %1726 = vmatprep.subr.bf16.mxu1 %v1725_v40  ;;  %v310_v40 = vld [vmem:[%s2131_s6 + $0x350] sm:$0xff]  ;;  %v1715_v47 = vpack.c.bf16 %v279_v39, %v278_v38  ;;  %v369_v38 = vld [vmem:[%s2131_s6 + $0x528] sm:$0xff] }
  0x81   : > { %v1747_v48 = vpack.c.bf16 %v311_v41, %v310_v40  ;;  %v354_v39 = vld [vmem:[%s2131_s6 + $0x4b0] sm:$0xff]  ;;  %v355_v40 = vld [vmem:[%s2131_s6 + $0x4b8] sm:$0xff] }
  0x82   : > { %v386_v41 = vld [vmem:[%s2131_s6 + $0x5b0] sm:$0xff] }
  0x85   : > { %1356 = vmatmul.mubr.f32.vlgmr.msra.gmra.mrb[0].mxu0 %v2171_v45 }
  0x86   : > { %1390 = vmatmul.mubr.f32.vlgmr.msra.gmra.mrb[0].mxu1 %v2171_v45  ;;  %1696 = vmatpush3.bf16.xpose.msra.mxu0 %v1695_v50  ;;  %v1749_v50 = vpack.c.bf16 %v329_v46, %v328_v44  ;;  %v1769_v46 = vpack.c.bf16 %v355_v40, %v354_v39  ;;  %v445_v39 = vld [vmem:[%s2131_s6 + $0x788] sm:$0xff] }
  0x87   : > { %1728 = vmatpush3.bf16.xpose.msra.mxu1 %v1727_v51  ;;  %1698 = vmatprep.subr.bf16.mxu0 %v1697_v52  ;;  %v280_v51 = vld [vmem:[%s2131_s6 + $0x260] sm:$0xff]  ;;  %v281_v52 = vld [vmem:[%s2131_s6 + $0x268] sm:$0xff] }
  0x88   : > { %1730 = vmatprep.subr.bf16.mxu1 %v1729_v53  ;;  %1423 = vmatprep.mubr.f32.mxu0 %v2171_v45  ;;  %v312_v53 = vld [vmem:[%s2131_s6 + $0x360] sm:$0xff]  ;;  %v1719_v59 = vpack.c.bf16 %v281_v52, %v280_v51  ;;  %v371_v51 = vld [vmem:[%s2131_s6 + $0x538] sm:$0xff] }
  0x89   : > { %1457 = vmatprep.mubr.f32.mxu1 %v2171_v45  ;;  %v1751_v60 = vpack.c.bf16 %v313_v54, %v312_v53  ;;  %v356_v52 = vld [vmem:[%s2131_s6 + $0x4c0] sm:$0xff]  ;;  %v357_v53 = vld [vmem:[%s2131_s6 + $0x4c8] sm:$0xff] }
  0x8a   : > { %v388_v54 = vld [vmem:[%s2131_s6 + $0x5c0] sm:$0xff] }
  0x8e   : > { %1700 = vmatpush3.bf16.xpose.msra.mxu0 %v1699_v62  ;;  %v1753_v62 = vpack.c.bf16 %v331_v58, %v330_v57  ;;  %v1773_v58 = vpack.c.bf16 %v357_v53, %v356_v52  ;;  %v447_v52 = vld [vmem:[%s2131_s6 + $0x798] sm:$0xff] }
  0x8f   : > { %1732 = vmatpush3.bf16.xpose.msra.mxu1 %v1731_v63  ;;  %1702 = vmatprep.subr.bf16.mxu0 %v1701_v0  ;;  %v282_v63 = vld [vmem:[%s2131_s6 + $0x270] sm:$0xff]  ;;  %v283_v0 = vld [vmem:[%s2131_s6 + $0x278] sm:$0xff] }
  0x90   : > { %1734 = vmatprep.subr.bf16.mxu1 %v1733_v1  ;;  %v314_v1 = vld [vmem:[%s2131_s6 + $0x370] sm:$0xff]  ;;  %v1723_v7 = vpack.c.bf16 %v283_v0, %v282_v63  ;;  %v373_v63 = vld [vmem:[%s2131_s6 + $0x548] sm:$0xff] }
  0x91   : > { %v1755_v8 = vpack.c.bf16 %v315_v2, %v314_v1  ;;  %v358_v0 = vld [vmem:[%s2131_s6 + $0x4d0] sm:$0xff]  ;;  %v359_v1 = vld [vmem:[%s2131_s6 + $0x4d8] sm:$0xff] }
  0x92   : > { %v390_v2 = vld [vmem:[%s2131_s6 + $0x5d0] sm:$0xff] }
  0x96   : > { %1704 = vmatpush3.bf16.xpose.msra.mxu0 %v1703_v10  ;;  %v1789_v10 = vpack.c.bf16 %v381_v6, %v380_v5  ;;  %v1777_v6 = vpack.c.bf16 %v359_v1, %v358_v0  ;;  %v449_v0 = vld [vmem:[%s2131_s6 + $0x7a8] sm:$0xff] }
  0x97   : > { %1736 = vmatpush3.bf16.xpose.msra.mxu1 %v1735_v11  ;;  %1706 = vmatprep.subr.bf16.mxu0 %v1705_v12  ;;  %v332_v11 = vld [vmem:[%s2131_s6 + $0x400] sm:$0xff]  ;;  %v333_v12 = vld [vmem:[%s2131_s6 + $0x408] sm:$0xff] }
  0x98   : > { %1738 = vmatprep.subr.bf16.mxu1 %v1737_v13  ;;  %v364_v13 = vld [vmem:[%s2131_s6 + $0x500] sm:$0xff]  ;;  %v1759_v19 = vpack.c.bf16 %v333_v12, %v332_v11  ;;  %v375_v11 = vld [vmem:[%s2131_s6 + $0x558] sm:$0xff] }
  0x99   : > { %v1791_v20 = vpack.c.bf16 %v365_v14, %v364_v13  ;;  %v360_v12 = vld [vmem:[%s2131_s6 + $0x4e0] sm:$0xff]  ;;  %v361_v13 = vld [vmem:[%s2131_s6 + $0x4e8] sm:$0xff] }
  0x9a   : > { %v392_v14 = vld [vmem:[%s2131_s6 + $0x5e0] sm:$0xff] }
  0x9e   : > { %1708 = vmatpush3.bf16.xpose.msra.mxu0 %v1707_v22  ;;  %v1793_v22 = vpack.c.bf16 %v383_v18, %v382_v17  ;;  %v1781_v18 = vpack.c.bf16 %v361_v13, %v360_v12  ;;  %v451_v12 = vld [vmem:[%s2131_s6 + $0x7b8] sm:$0xff] }
  0x9f   : > { %1740 = vmatpush3.bf16.xpose.msra.mxu1 %v1739_v23  ;;  %1710 = vmatprep.subr.bf16.mxu0 %v1709_v24  ;;  %v334_v23 = vld [vmem:[%s2131_s6 + $0x410] sm:$0xff]  ;;  %v335_v24 = vld [vmem:[%s2131_s6 + $0x418] sm:$0xff] }
  0xa0   : > { %1742 = vmatprep.subr.bf16.mxu1 %v1741_v25  ;;  %v366_v25 = vld [vmem:[%s2131_s6 + $0x510] sm:$0xff]  ;;  %v1763_v31 = vpack.c.bf16 %v335_v24, %v334_v23  ;;  %v377_v23 = vld [vmem:[%s2131_s6 + $0x568] sm:$0xff] }
  0xa1   : > { %v1795_v32 = vpack.c.bf16 %v367_v26, %v366_v25  ;;  %v362_v24 = vld [vmem:[%s2131_s6 + $0x4f0] sm:$0xff]  ;;  %v363_v25 = vld [vmem:[%s2131_s6 + $0x4f8] sm:$0xff] }
  0xa2   : > { %v394_v26 = vld [vmem:[%s2131_s6 + $0x5f0] sm:$0xff] }
  0xa6   : > { %1712 = vmatpush3.bf16.xpose.msra.mxu0 %v1711_v34  ;;  %v1797_v34 = vpack.c.bf16 %v385_v30, %v384_v29  ;;  %v1785_v30 = vpack.c.bf16 %v363_v25, %v362_v24  ;;  %v453_v24 = vld [vmem:[%s2131_s6 + $0x7c8] sm:$0xff] }
  0xa7   : > { %1744 = vmatpush3.bf16.xpose.msra.mxu1 %v1743_v35  ;;  %1714 = vmatprep.subr.bf16.mxu0 %v1713_v36  ;;  %v336_v35 = vld [vmem:[%s2131_s6 + $0x420] sm:$0xff]  ;;  %v337_v36 = vld [vmem:[%s2131_s6 + $0x428] sm:$0xff] }
  0xa8   : > { %1746 = vmatprep.subr.bf16.mxu1 %v1745_v37  ;;  %v368_v37 = vld [vmem:[%s2131_s6 + $0x520] sm:$0xff]  ;;  %v1767_v43 = vpack.c.bf16 %v337_v36, %v336_v35  ;;  %v379_v35 = vld [vmem:[%s2131_s6 + $0x578] sm:$0xff] }
  0xa9   : > { %v1799_v44 = vpack.c.bf16 %v369_v38, %v368_v37  ;;  %v412_v36 = vld [vmem:[%s2131_s6 + $0x680] sm:$0xff]  ;;  %v413_v37 = vld [vmem:[%s2131_s6 + $0x688] sm:$0xff] }
  0xaa   : > { %v444_v38 = vld [vmem:[%s2131_s6 + $0x780] sm:$0xff] }
  0xae   : > { %1716 = vmatpush3.bf16.xpose.msra.mxu0 %v1715_v47  ;;  %v1801_v47 = vpack.c.bf16 %v387_v42, %v386_v41  ;;  %v1821_v42 = vpack.c.bf16 %v413_v37, %v412_v36  ;;  %v455_v36 = vld [vmem:[%s2131_s6 + $0x7d8] sm:$0xff] }
  0xaf   : > { %1748 = vmatpush3.bf16.xpose.msra.mxu1 %v1747_v48  ;;  %1718 = vmatprep.subr.bf16.mxu0 %v1717_v49  ;;  %v338_v48 = vld [vmem:[%s2131_s6 + $0x430] sm:$0xff]  ;;  %v339_v49 = vld [vmem:[%s2131_s6 + $0x438] sm:$0xff] }
  0xb0   : > { %1750 = vmatprep.subr.bf16.mxu1 %v1749_v50  ;;  %v370_v50 = vld [vmem:[%s2131_s6 + $0x530] sm:$0xff]  ;;  %v1771_v56 = vpack.c.bf16 %v339_v49, %v338_v48  ;;  %v429_v48 = vld [vmem:[%s2131_s6 + $0x708] sm:$0xff] }
  0xb1   : > { %v1803_v57 = vpack.c.bf16 %v371_v51, %v370_v50  ;;  %v414_v49 = vld [vmem:[%s2131_s6 + $0x690] sm:$0xff]  ;;  %v415_v50 = vld [vmem:[%s2131_s6 + $0x698] sm:$0xff] }
  0xb2   : > { %v446_v51 = vld [vmem:[%s2131_s6 + $0x790] sm:$0xff] }
  0xb6   : > { %1720 = vmatpush3.bf16.xpose.msra.mxu0 %v1719_v59  ;;  %v1805_v59 = vpack.c.bf16 %v389_v55, %v388_v54  ;;  %v1825_v55 = vpack.c.bf16 %v415_v50, %v414_v49  ;;  %v457_v49 = vld [vmem:[%s2131_s6 + $0x7e8] sm:$0xff] }
  0xb7   : > { %1752 = vmatpush3.bf16.xpose.msra.mxu1 %v1751_v60  ;;  %1722 = vmatprep.subr.bf16.mxu0 %v1721_v61  ;;  %v340_v60 = vld [vmem:[%s2131_s6 + $0x440] sm:$0xff]  ;;  %v341_v61 = vld [vmem:[%s2131_s6 + $0x448] sm:$0xff] }
  0xb8   : > { %1754 = vmatprep.subr.bf16.mxu1 %v1753_v62  ;;  %v372_v62 = vld [vmem:[%s2131_s6 + $0x540] sm:$0xff]  ;;  %v1775_v4 = vpack.c.bf16 %v341_v61, %v340_v60  ;;  %v431_v60 = vld [vmem:[%s2131_s6 + $0x718] sm:$0xff] }
  0xb9   : > { %v1807_v5 = vpack.c.bf16 %v373_v63, %v372_v62  ;;  %v416_v61 = vld [vmem:[%s2131_s6 + $0x6a0] sm:$0xff]  ;;  %v417_v62 = vld [vmem:[%s2131_s6 + $0x6a8] sm:$0xff] }
  0xba   : > { %v448_v63 = vld [vmem:[%s2131_s6 + $0x7a0] sm:$0xff] }
  0xbe   : > { %1724 = vmatpush3.bf16.xpose.msra.mxu0 %v1723_v7  ;;  %v1809_v7 = vpack.c.bf16 %v391_v3, %v390_v2  ;;  %v1829_v3 = vpack.c.bf16 %v417_v62, %v416_v61  ;;  %v459_v61 = vld [vmem:[%s2131_s6 + $0x7f8] sm:$0xff] }
  0xbf   : > { %1756 = vmatpush3.bf16.xpose.msra.mxu1 %v1755_v8  ;;  %1758 = vmatprep.subr.bf16.mxu0 %v1757_v9  ;;  %v342_v8 = vld [vmem:[%s2131_s6 + $0x450] sm:$0xff]  ;;  %v343_v9 = vld [vmem:[%s2131_s6 + $0x458] sm:$0xff] }
  0xc0   : > { %1790 = vmatprep.subr.bf16.mxu1 %v1789_v10  ;;  %v374_v10 = vld [vmem:[%s2131_s6 + $0x550] sm:$0xff]  ;;  %v1779_v16 = vpack.c.bf16 %v343_v9, %v342_v8  ;;  %v433_v8 = vld [vmem:[%s2131_s6 + $0x728] sm:$0xff] }
  0xc1   : > { %v1811_v17 = vpack.c.bf16 %v375_v11, %v374_v10  ;;  %v418_v9 = vld [vmem:[%s2131_s6 + $0x6b0] sm:$0xff]  ;;  %v419_v10 = vld [vmem:[%s2131_s6 + $0x6b8] sm:$0xff] }
  0xc2   : > { %v450_v11 = vld [vmem:[%s2131_s6 + $0x7b0] sm:$0xff] }
  0xc5   : > { %1424 = vmatmul.mubr.f32.vlgmr.msra.gmra.mrb[2].mxu0 %v2171_v45 }
  0xc6   : > { %1458 = vmatmul.mubr.f32.vlgmr.msra.gmra.mrb[2].mxu1 %v2171_v45  ;;  %1760 = vmatpush3.bf16.xpose.msra.mxu0 %v1759_v19  ;;  %v1813_v19 = vpack.c.bf16 %v393_v15, %v392_v14  ;;  %v1833_v15 = vpack.c.bf16 %v419_v10, %v418_v9 }
  0xc7   : > { %1792 = vmatpush3.bf16.xpose.msra.mxu1 %v1791_v20  ;;  %1762 = vmatprep.subr.bf16.mxu0 %v1761_v21  ;;  %v344_v20 = vld [vmem:[%s2131_s6 + $0x460] sm:$0xff]  ;;  %v345_v21 = vld [vmem:[%s2131_s6 + $0x468] sm:$0xff] }
  0xc8   : > { %1794 = vmatprep.subr.bf16.mxu1 %v1793_v22  ;;  %1491 = vmatprep.mubr.f32.mxu0 %v2171_v45  ;;  %v376_v22 = vld [vmem:[%s2131_s6 + $0x560] sm:$0xff]  ;;  %v1783_v28 = vpack.c.bf16 %v345_v21, %v344_v20  ;;  %v435_v20 = vld [vmem:[%s2131_s6 + $0x738] sm:$0xff] }
  0xc9   : > { %1525 = vmatprep.mubr.f32.mxu1 %v2171_v45  ;;  %v1815_v29 = vpack.c.bf16 %v377_v23, %v376_v22  ;;  %v420_v21 = vld [vmem:[%s2131_s6 + $0x6c0] sm:$0xff]  ;;  %v421_v22 = vld [vmem:[%s2131_s6 + $0x6c8] sm:$0xff] }
  0xca   : > { %v452_v23 = vld [vmem:[%s2131_s6 + $0x7c0] sm:$0xff] }
  0xce   : > { %1764 = vmatpush3.bf16.xpose.msra.mxu0 %v1763_v31  ;;  %v1817_v31 = vpack.c.bf16 %v395_v27, %v394_v26  ;;  %v1837_v27 = vpack.c.bf16 %v421_v22, %v420_v21 }
  0xcf   : > { %1796 = vmatpush3.bf16.xpose.msra.mxu1 %v1795_v32  ;;  %1766 = vmatprep.subr.bf16.mxu0 %v1765_v33  ;;  %v346_v32 = vld [vmem:[%s2131_s6 + $0x470] sm:$0xff]  ;;  %v347_v33 = vld [vmem:[%s2131_s6 + $0x478] sm:$0xff] }
  0xd0   : > { %1798 = vmatprep.subr.bf16.mxu1 %v1797_v34  ;;  %v378_v34 = vld [vmem:[%s2131_s6 + $0x570] sm:$0xff]  ;;  %v1787_v40 = vpack.c.bf16 %v347_v33, %v346_v32  ;;  %v437_v32 = vld [vmem:[%s2131_s6 + $0x748] sm:$0xff] }
  0xd1   : > { %v1819_v41 = vpack.c.bf16 %v379_v35, %v378_v34  ;;  %v422_v33 = vld [vmem:[%s2131_s6 + $0x6d0] sm:$0xff]  ;;  %v423_v34 = vld [vmem:[%s2131_s6 + $0x6d8] sm:$0xff] }
  0xd2   : > { %v454_v35 = vld [vmem:[%s2131_s6 + $0x7d0] sm:$0xff] }
  0xd6   : > { %1768 = vmatpush3.bf16.xpose.msra.mxu0 %v1767_v43  ;;  %v1853_v43 = vpack.c.bf16 %v445_v39, %v444_v38  ;;  %v1841_v39 = vpack.c.bf16 %v423_v34, %v422_v33  ;;  %v466_v34 = vld [vmem:[%s2131_s6 + $0x830] sm:$0xff] }
  0xd7   : > { %1800 = vmatpush3.bf16.xpose.msra.mxu1 %v1799_v44  ;;  %1770 = vmatprep.subr.bf16.mxu0 %v1769_v46  ;;  %v396_v44 = vld [vmem:[%s2131_s6 + $0x600] sm:$0xff]  ;;  %v397_v46 = vld [vmem:[%s2131_s6 + $0x608] sm:$0xff] }
  0xd8   : > { %1802 = vmatprep.subr.bf16.mxu1 %v1801_v47  ;;  %v428_v47 = vld [vmem:[%s2131_s6 + $0x700] sm:$0xff]  ;;  %v1823_v53 = vpack.c.bf16 %v397_v46, %v396_v44  ;;  %v439_v44 = vld [vmem:[%s2131_s6 + $0x758] sm:$0xff] }
  0xd9   : > { %v1855_v54 = vpack.c.bf16 %v429_v48, %v428_v47  ;;  %v424_v46 = vld [vmem:[%s2131_s6 + $0x6e0] sm:$0xff]  ;;  %v425_v47 = vld [vmem:[%s2131_s6 + $0x6e8] sm:$0xff] }
  0xda   : > { %v456_v48 = vld [vmem:[%s2131_s6 + $0x7e0] sm:$0xff] }
  0xde   : > { %1772 = vmatpush3.bf16.xpose.msra.mxu0 %v1771_v56  ;;  %v1857_v56 = vpack.c.bf16 %v447_v52, %v446_v51  ;;  %v1845_v52 = vpack.c.bf16 %v425_v47, %v424_v46 }
  0xdf   : > { %1804 = vmatpush3.bf16.xpose.msra.mxu1 %v1803_v57  ;;  %1774 = vmatprep.subr.bf16.mxu0 %v1773_v58  ;;  %v398_v57 = vld [vmem:[%s2131_s6 + $0x610] sm:$0xff]  ;;  %v399_v58 = vld [vmem:[%s2131_s6 + $0x618] sm:$0xff] }
  0xe0   : > { %1806 = vmatprep.subr.bf16.mxu1 %v1805_v59  ;;  %v430_v59 = vld [vmem:[%s2131_s6 + $0x710] sm:$0xff]  ;;  %v1827_v1 = vpack.c.bf16 %v399_v58, %v398_v57  ;;  %v441_v57 = vld [vmem:[%s2131_s6 + $0x768] sm:$0xff] }
  0xe1   : > { %v1859_v2 = vpack.c.bf16 %v431_v60, %v430_v59  ;;  %v426_v58 = vld [vmem:[%s2131_s6 + $0x6f0] sm:$0xff]  ;;  %v427_v59 = vld [vmem:[%s2131_s6 + $0x6f8] sm:$0xff] }
  0xe2   : > { %v458_v60 = vld [vmem:[%s2131_s6 + $0x7f0] sm:$0xff] }
  0xe6   : > { %1776 = vmatpush3.bf16.xpose.msra.mxu0 %v1775_v4  ;;  %v1861_v4 = vpack.c.bf16 %v449_v0, %v448_v63  ;;  %v1849_v0 = vpack.c.bf16 %v427_v59, %v426_v58 }
  0xe7   : > { %1808 = vmatpush3.bf16.xpose.msra.mxu1 %v1807_v5  ;;  %1778 = vmatprep.subr.bf16.mxu0 %v1777_v6  ;;  %v400_v5 = vld [vmem:[%s2131_s6 + $0x620] sm:$0xff]  ;;  %v401_v6 = vld [vmem:[%s2131_s6 + $0x628] sm:$0xff] }
  0xe8   : > { %1810 = vmatprep.subr.bf16.mxu1 %v1809_v7  ;;  %v432_v7 = vld [vmem:[%s2131_s6 + $0x720] sm:$0xff]  ;;  %v1831_v13 = vpack.c.bf16 %v401_v6, %v400_v5  ;;  %v443_v5 = vld [vmem:[%s2131_s6 + $0x778] sm:$0xff] }
  0xe9   : > { %v1863_v14 = vpack.c.bf16 %v433_v8, %v432_v7  ;;  %v476_v6 = vld [vmem:[%s2131_s6 + $0x880] sm:$0xff]  ;;  %v477_v7 = vld [vmem:[%s2131_s6 + $0x888] sm:$0xff] }
  0xea   : > { %v1885_v10 = vpack.c.bf16 %v477_v7, %v476_v6  ;;  %v491_v6 = vld [vmem:[%s2131_s6 + $0x8f8] sm:$0xff] }
  0xee   : > { %1780 = vmatpush3.bf16.xpose.msra.mxu0 %v1779_v16  ;;  %v1865_v16 = vpack.c.bf16 %v451_v12, %v450_v11  ;;  %v460_v11 = vld [vmem:[%s2131_s6 + $0x800] sm:$0xff]  ;;  %v461_v12 = vld [vmem:[%s2131_s6 + $0x808] sm:$0xff] }
  0xef   : > { %1812 = vmatpush3.bf16.xpose.msra.mxu1 %v1811_v17  ;;  %1782 = vmatprep.subr.bf16.mxu0 %v1781_v18  ;;  %v402_v17 = vld [vmem:[%s2131_s6 + $0x630] sm:$0xff]  ;;  %v403_v18 = vld [vmem:[%s2131_s6 + $0x638] sm:$0xff] }
  0xf0   : > { %1814 = vmatprep.subr.bf16.mxu1 %v1813_v19  ;;  %v434_v19 = vld [vmem:[%s2131_s6 + $0x730] sm:$0xff]  ;;  %v1835_v25 = vpack.c.bf16 %v403_v18, %v402_v17  ;;  %v463_v18 = vld [vmem:[%s2131_s6 + $0x818] sm:$0xff] }
  0xf1   : > { %v1867_v26 = vpack.c.bf16 %v435_v20, %v434_v19  ;;  %v462_v17 = vld [vmem:[%s2131_s6 + $0x810] sm:$0xff]  ;;  %v480_v19 = vld [vmem:[%s2131_s6 + $0x8a0] sm:$0xff]  ;;  %v481_v20 = vld [vmem:[%s2131_s6 + $0x8a8] sm:$0xff] }
  0xf2   : > { %v1891_v21 = vpack.c.bf16 %v463_v18, %v462_v17  ;;  %v1893_v22 = vpack.c.bf16 %v481_v20, %v480_v19 }
  0xf6   : > { %1784 = vmatpush3.bf16.xpose.msra.mxu0 %v1783_v28  ;;  %v1869_v28 = vpack.c.bf16 %v453_v24, %v452_v23  ;;  %v464_v23 = vld [vmem:[%s2131_s6 + $0x820] sm:$0xff]  ;;  %v465_v24 = vld [vmem:[%s2131_s6 + $0x828] sm:$0xff] }
  0xf7   : > { %1816 = vmatpush3.bf16.xpose.msra.mxu1 %v1815_v29  ;;  %1786 = vmatprep.subr.bf16.mxu0 %v1785_v30  ;;  %v404_v29 = vld [vmem:[%s2131_s6 + $0x640] sm:$0xff]  ;;  %v405_v30 = vld [vmem:[%s2131_s6 + $0x648] sm:$0xff] }
  0xf8   : > { %1818 = vmatprep.subr.bf16.mxu1 %v1817_v31  ;;  %v436_v31 = vld [vmem:[%s2131_s6 + $0x740] sm:$0xff]  ;;  %v1839_v37 = vpack.c.bf16 %v405_v30, %v404_v29 }
  0xf9   : > { %v1871_v38 = vpack.c.bf16 %v437_v32, %v436_v31  ;;  %v2434_v31 = vpop.permute.xlu0 %495 }
  0xfe   : > { %1788 = vmatpush3.bf16.xpose.msra.mxu0 %v1787_v40  ;;  %v1873_v40 = vpack.c.bf16 %v455_v36, %v454_v35  ;;  %v467_v35 = vld [vmem:[%s2131_s6 + $0x838] sm:$0xff] }
  0xff   : > { %1820 = vmatpush3.bf16.xpose.msra.mxu1 %v1819_v41  ;;  %1822 = vmatprep.subr.bf16.mxu0 %v1821_v42  ;;  %v406_v41 = vld [vmem:[%s2131_s6 + $0x650] sm:$0xff]  ;;  %v407_v42 = vld [vmem:[%s2131_s6 + $0x658] sm:$0xff]  ;;  %v1899_v47 = vpack.c.bf16 %v467_v35, %v466_v34 }
 0x100   : > { %1854 = vmatprep.subr.bf16.mxu1 %v1853_v43  ;;  %v438_v43 = vld [vmem:[%s2131_s6 + $0x750] sm:$0xff]  ;;  %v1843_v50 = vpack.c.bf16 %v407_v42, %v406_v41 }
 0x101   : > { %v1875_v51 = vpack.c.bf16 %v439_v44, %v438_v43 }
 0x105   : > { %1492 = vmatmul.mubr.f32.vlgmr.msra.gmra.mrb[4].mxu0 %v2171_v45 }
 0x106   : > { %1526 = vmatmul.mubr.f32.vlgmr.msra.gmra.mrb[4].mxu1 %v2171_v45  ;;  %1824 = vmatpush3.bf16.xpose.msra.mxu0 %v1823_v53  ;;  %v1877_v53 = vpack.c.bf16 %v457_v49, %v456_v48 }
 0x107   : > { %1856 = vmatpush3.bf16.xpose.msra.mxu1 %v1855_v54  ;;  %1826 = vmatprep.subr.bf16.mxu0 %v1825_v55  ;;  %v408_v54 = vld [vmem:[%s2131_s6 + $0x660] sm:$0xff]  ;;  %v409_v55 = vld [vmem:[%s2131_s6 + $0x668] sm:$0xff] }
 0x108   : > { %1858 = vmatprep.subr.bf16.mxu1 %v1857_v56  ;;  %1559 = vmatprep.mubr.f32.mxu0 %v2171_v45  ;;  %v440_v56 = vld [vmem:[%s2131_s6 + $0x760] sm:$0xff]  ;;  %v1847_v62 = vpack.c.bf16 %v409_v55, %v408_v54  ;;  %v469_v55 = vld [vmem:[%s2131_s6 + $0x848] sm:$0xff] }
 0x109   : > { %1593 = vmatprep.mubr.f32.mxu1 %v2171_v45  ;;  %v1879_v63 = vpack.c.bf16 %v441_v57, %v440_v56  ;;  %v468_v54 = vld [vmem:[%s2131_s6 + $0x840] sm:$0xff]  ;;  %v486_v56 = vld [vmem:[%s2131_s6 + $0x8d0] sm:$0xff]  ;;  %v487_v57 = vld [vmem:[%s2131_s6 + $0x8d8] sm:$0xff] }
 0x10a   : > { %v1903_v59 = vpack.c.bf16 %v469_v55, %v468_v54 }
 0x10e   : > { %1828 = vmatpush3.bf16.xpose.msra.mxu0 %v1827_v1  ;;  %v1881_v1 = vpack.c.bf16 %v459_v61, %v458_v60  ;;  %v1905_v60 = vpack.c.bf16 %v487_v57, %v486_v56  ;;  %v470_v61 = vld [vmem:[%s2131_s6 + $0x850] sm:$0xff] }
 0x10f   : > { %1860 = vmatpush3.bf16.xpose.msra.mxu1 %v1859_v2  ;;  %1830 = vmatprep.subr.bf16.mxu0 %v1829_v3  ;;  %v410_v2 = vld [vmem:[%s2131_s6 + $0x670] sm:$0xff]  ;;  %v411_v3 = vld [vmem:[%s2131_s6 + $0x678] sm:$0xff] }
 0x110   : > { %1862 = vmatprep.subr.bf16.mxu1 %v1861_v4  ;;  %v442_v4 = vld [vmem:[%s2131_s6 + $0x770] sm:$0xff]  ;;  %v1851_v8 = vpack.c.bf16 %v411_v3, %v410_v2  ;;  %v472_v3 = vld [vmem:[%s2131_s6 + $0x860] sm:$0xff] }
 0x111   : > { %v1883_v9 = vpack.c.bf16 %v443_v5, %v442_v4  ;;  %v473_v4 = vld [vmem:[%s2131_s6 + $0x868] sm:$0xff]  ;;  %v490_v5 = vld [vmem:[%s2131_s6 + $0x8f0] sm:$0xff] }
 0x112   : > { %v1911_v7 = vpack.c.bf16 %v473_v4, %v472_v3 }
 0x116   : > { %1832 = vmatpush3.bf16.xpose.msra.mxu0 %v1831_v13  ;;  %v478_v13 = vld [vmem:[%s2131_s6 + $0x890] sm:$0xff] }
 0x117   : > { %1864 = vmatpush3.bf16.xpose.msra.mxu1 %v1863_v14  ;;  %1834 = vmatprep.subr.bf16.mxu0 %v1833_v15  ;;  %v479_v14 = vld [vmem:[%s2131_s6 + $0x898] sm:$0xff]  ;;  %v1887_v15 = vpack.c.bf16 %v461_v12, %v460_v11  ;;  %v1957_v12 = vld [vmem:[%s2510_s1] sm:$0x3] }
 0x118   : > { %1866 = vmatprep.subr.bf16.mxu1 %v1865_v16  ;;  %v1889_v16 = vpack.c.bf16 %v479_v14, %v478_v13 }
 0x11e   : > { %1836 = vmatpush3.bf16.xpose.msra.mxu0 %v1835_v25  ;;  %v482_v25 = vld [vmem:[%s2131_s6 + $0x8b0] sm:$0xff] }
 0x11f   : > { %1868 = vmatpush3.bf16.xpose.msra.mxu1 %v1867_v26  ;;  %1838 = vmatprep.subr.bf16.mxu0 %v1837_v27  ;;  %v483_v26 = vld [vmem:[%s2131_s6 + $0x8b8] sm:$0xff]  ;;  %v1895_v27 = vpack.c.bf16 %v465_v24, %v464_v23 }
 0x120   : > { %1870 = vmatprep.subr.bf16.mxu1 %v1869_v28  ;;  %v2026_v28 = vmov 1983009808   ;;  %v1897_v30 = vpack.c.bf16 %v483_v26, %v482_v25 }
 0x121   : > { %v1158_v29 = vunpack.c.l.s4 %v2026_v28 }
 0x123   : > { %v1159_v32 = vunpack.c.0.s8 %v1158_v29 }
 0x126   : > { %1840 = vmatpush3.bf16.xpose.msra.mxu0 %v1839_v37  ;;  %v484_v37 = vld [vmem:[%s2131_s6 + $0x8c0] sm:$0xff] }
 0x127   : > { %1872 = vmatpush3.bf16.xpose.msra.mxu1 %v1871_v38  ;;  %1842 = vmatprep.subr.bf16.mxu0 %v1841_v39  ;;  %v485_v38 = vld [vmem:[%s2131_s6 + $0x8c8] sm:$0xff] }
 0x128   : > { %1874 = vmatprep.subr.bf16.mxu1 %v1873_v40  ;;  %v1901_v49 = vpack.c.bf16 %v485_v38, %v484_v37 }
 0x12e   : > { %1844 = vmatpush3.bf16.xpose.msra.mxu0 %v1843_v50 }
 0x12f   : > { %1876 = vmatpush3.bf16.xpose.msra.mxu1 %v1875_v51  ;;  %1846 = vmatprep.subr.bf16.mxu0 %v1845_v52 }
 0x130   : > { %1878 = vmatprep.subr.bf16.mxu1 %v1877_v53 }
 0x136   : > { %1848 = vmatpush3.bf16.xpose.msra.mxu0 %v1847_v62  ;;  %v471_v62 = vld [vmem:[%s2131_s6 + $0x858] sm:$0xff] }
 0x137   : > { %1880 = vmatpush3.bf16.xpose.msra.mxu1 %v1879_v63  ;;  %1850 = vmatprep.subr.bf16.mxu0 %v1849_v0  ;;  %v488_v63 = vld [vmem:[%s2131_s6 + $0x8e0] sm:$0xff]  ;;  %v489_v0 = vld [vmem:[%s2131_s6 + $0x8e8] sm:$0xff] }
 0x138   : > { %1882 = vmatprep.subr.bf16.mxu1 %v1881_v1  ;;  %v1907_v1 = vpack.c.bf16 %v471_v62, %v470_v61  ;;  %v1909_v2 = vpack.c.bf16 %v489_v0, %v488_v63 }
 0x13e   : > { %1852 = vmatpush3.bf16.xpose.msra.mxu0 %v1851_v8  ;;  %v1913_v8 = vpack.c.bf16 %v491_v6, %v490_v5 }
 0x13f   : > { %1884 = vmatpush3.bf16.xpose.msra.mxu1 %v1883_v9  ;;  %1886 = vmatprep.subr.bf16.mxu0 %v1885_v10  ;;  %v474_v9 = vld [vmem:[%s2131_s6 + $0x870] sm:$0xff]  ;;  %v475_v10 = vld [vmem:[%s2131_s6 + $0x878] sm:$0xff] }
 0x140   : > { %v1915_v11 = vpack.c.bf16 %v475_v10, %v474_v9 }
 0x145   : > { %1560 = vmatmul.mubr.f32.vlgmr.msra.gmra.mrb[6].mxu0 %v2171_v45 }
 0x146   : > { %1594 = vmatmul.mubr.f32.vlgmr.msra.gmra.mrb[6].mxu1 %v2171_v45  ;;  %1888 = vmatpush3.bf16.xpose.msra.mxu0 %v1887_v15 }
 0x147   : > { %1890 = vmatprep.subr.bf16.mxu0 %v1889_v16  ;;  %1627 = vmatprep.mubr.f32.mxu0 %v2171_v45  ;;  %v1160_v45 = vlaneseq }
 0x149   : > { %v1161_v33 = vshrl.u32 %v1160_v45, 7 }
 0x14b   : > { %v2443_v43 = vsub.s32 %v1159_v32, %v1161_v33 }
 0x14e   : > { %1892 = vmatpush3.bf16.xpose.msra.mxu0 %v1891_v21 }
 0x14f   : > { %1894 = vmatprep.subr.bf16.mxu0 %v1893_v22 }
 0x156   : > { %1896 = vmatpush3.bf16.xpose.msra.mxu0 %v1895_v27 }
 0x157   : > { %1898 = vmatprep.subr.bf16.mxu0 %v1897_v30 }
 0x158   : > { %v564_v36 = vpop.f32.mrb[0].mxu0 }
 0x159   : > { %v635_v39 = vpop.f32.mrb[0].mxu1  ;;  %v565_v40 = vadd.f32 %v564_v36, %v2434_v31  ;;  %v566_v41 = vpop.f32.mrb[1].mxu0 }
 0x15a   : > { %v567_v42 = vadd.f32 %v566_v41, %v2434_v31  ;;  %v636_v44 = vadd.f32 %v635_v39, %v2434_v31  ;;  %v637_v46 = vpop.f32.mrb[1].mxu1 }
 0x15b   : > { %v638_v48 = vadd.f32 %v637_v46, %v2434_v31 }
 0x15c   : > { %v1155_v50 = vcombine.low %v565_v40, %v567_v42 }
 0x15d   : > { %v1156_v51 = vcombine.low %v636_v44, %v638_v48 }
 0x15e   : > { %v1163_v52 = vrot.slane %v1155_v50, %v2443_v43  ;;  %1900 = vmatpush3.bf16.xpose.msra.mxu0 %v1899_v47 }
 0x15f   : > { %v1170_v53 = vrot.slane %v1156_v51, %v2443_v43  ;;  %1902 = vmatprep.subr.bf16.mxu0 %v1901_v49 }
 0x161   : > { %v1171_v58 = vcombine.low %v1163_v52, %v1170_v53 }
 0x163   : > { %1236 = vst [vmem:[%s2454_s9] sm:$0xff] %v1171_v58 }
 0x166   : > { %1904 = vmatpush3.bf16.xpose.msra.mxu0 %v1903_v59 }
 0x167   : > { %1906 = vmatprep.subr.bf16.mxu0 %v1905_v60 }
 0x16e   : > { %1908 = vmatpush3.bf16.xpose.msra.mxu0 %v1907_v1 }
 0x16f   : > { %1910 = vmatprep.subr.bf16.mxu0 %v1909_v2 }
 0x176   : > { %1912 = vmatpush3.bf16.xpose.msra.mxu0 %v1911_v7 }
 0x177   : > { %1914 = vmatprep.subr.bf16.mxu0 %v1913_v8 }
 0x17e   : > { %1916 = vmatpush3.bf16.xpose.msra.mxu0 %v1915_v11 }
 0x185   : > { %1628 = vmatmul.mubr.f32.vlgmr.msra.gmra.mrb[8].mxu0 %v1957_v12 }
 0x198   : > { %v706_v13 = vpop.f32.mrb[2].mxu0 }
 0x199   : > { %v707_v14 = vadd.f32 %v706_v13, %v2434_v31  ;;  %v777_v15 = vpop.f32.mrb[2].mxu1  ;;  %v708_v16 = vpop.f32.mrb[3].mxu0 }
 0x19a   : > { %v778_v17 = vadd.f32 %v777_v15, %v2434_v31  ;;  %v709_v18 = vadd.f32 %v708_v16, %v2434_v31  ;;  %v779_v19 = vpop.f32.mrb[3].mxu1 }
 0x19b   : > { %v780_v20 = vadd.f32 %v779_v19, %v2434_v31 }
 0x19c   : > { %v1172_v21 = vcombine.low %v707_v14, %v709_v18 }
 0x19d   : > { %v1173_v22 = vcombine.low %v778_v17, %v780_v20 }
 0x19e   : > { %v1180_v23 = vrot.slane %v1172_v21, %v2443_v43 }
 0x19f   : > { %v1187_v24 = vrot.slane %v1173_v22, %v2443_v43 }
 0x1a1   : > { %v1188_v25 = vcombine.low %v1180_v23, %v1187_v24 }
 0x1a3   : > { %1237 = vst [vmem:[%s2454_s9 + $0x8] sm:$0xff] %v1188_v25 }
 0x1d8   : > { %v848_v26 = vpop.f32.mrb[4].mxu0 }
 0x1d9   : > { %v849_v27 = vadd.f32 %v848_v26, %v2434_v31  ;;  %v919_v28 = vpop.f32.mrb[4].mxu1  ;;  %v850_v29 = vpop.f32.mrb[5].mxu0 }
 0x1da   : > { %v920_v45 = vadd.f32 %v919_v28, %v2434_v31  ;;  %v851_v30 = vadd.f32 %v850_v29, %v2434_v31  ;;  %v921_v32 = vpop.f32.mrb[5].mxu1 }
 0x1db   : > { %v922_v33 = vadd.f32 %v921_v32, %v2434_v31 }
 0x1dc   : > { %v1189_v34 = vcombine.low %v849_v27, %v851_v30 }
 0x1dd   : > { %v1190_v35 = vcombine.low %v920_v45, %v922_v33 }
 0x1de   : > { %v1197_v36 = vrot.slane %v1189_v34, %v2443_v43 }
 0x1df   : > { %v1204_v37 = vrot.slane %v1190_v35, %v2443_v43 }
 0x1e1   : > { %v1205_v38 = vcombine.low %v1197_v36, %v1204_v37 }
 0x1e3   : > { %1238 = vst [vmem:[%s2454_s9 + $0x10] sm:$0xff] %v1205_v38 }
 0x218   : > { %v990_v39 = vpop.f32.mrb[6].mxu0 }
 0x219   : > { %v991_v40 = vadd.f32 %v990_v39, %v2434_v31  ;;  %v1061_v41 = vpop.f32.mrb[6].mxu1  ;;  %v992_v42 = vpop.f32.mrb[7].mxu0 }
 0x21a   : > { %v1062_v44 = vadd.f32 %v1061_v41, %v2434_v31  ;;  %v993_v46 = vadd.f32 %v992_v42, %v2434_v31  ;;  %v1063_v47 = vpop.f32.mrb[7].mxu1 }
 0x21b   : > { %v1064_v48 = vadd.f32 %v1063_v47, %v2434_v31 }
 0x21c   : > { %v1206_v49 = vcombine.low %v991_v40, %v993_v46 }
 0x21d   : > { %v1207_v50 = vcombine.low %v1062_v44, %v1064_v48 }
 0x21e   : > { %v1214_v51 = vrot.slane %v1206_v49, %v2443_v43 }
 0x21f   : > { %v1221_v52 = vrot.slane %v1207_v50, %v2443_v43 }
 0x221   : > { %v1222_v53 = vcombine.low %v1214_v51, %v1221_v52 }
 0x223   : > { %1239 = vst [vmem:[%s2454_s9 + $0x18] sm:$0xff] %v1222_v53 }
 0x258   : > { %v1132_v54 = vpop.f32.mrb[8].mxu0 }
 0x259   : > { %v1133_v55 = vadd.f32 %v1132_v54, %v2434_v31  ;;  %v1134_v56 = vpop.f32.mrb[9].mxu0 }
 0x25a   : > { %v1135_v57 = vadd.f32 %v1134_v56, %v2434_v31 }
 0x25c   : > { %v1223_v58 = vcombine.low %v1133_v55, %v1135_v57 }
 0x25e   : > { %1319 = vst.sshfl [vmem:[%s2454_s9 + $0x20] sm:$0x33 pattern:$0x76325410] %v1223_v58 }
 0x25f PF: > { %p13_p9 = scmp.ge.s32.totalorder %s2067_s17, 4   ;;  %s2514_s12 = smov %s2012_s13 }
 0x260   : > { %s2515_s13 = smov %s2016_s14  ;;  %s2516_s14 = smov %s2077_s20 }
 0x261   : > { %s2517_s15 = smov %s2067_s17  ;;  %15 = sbr.rel (!%p13_p9) target bundleno = 3 (0x3), region = 72 }
 0x268   :  { %1263 = vsyncpa [#allocation3], 1 }
 0x269   :  { %1265 = vsyncpa [#allocation3 + $0x1], 1 }

</bundles_post_ra>
